<compile_context>
chip_gen: v5e
topology: v5e:2x2
jax: 0.10.0
libtpu: 0.0.40
codegen_flags: <defaults>
</compile_context>

<pallas_src>
import functools

import jax
import jax.numpy as jnp
from jax import lax
from jax.experimental import pallas as pl
from jax.experimental.pallas import tpu as pltpu


def _seg_split_kernel(x_ref, w_ref, b_ref, g_ref, be_ref, red_ref, bc_ref,
                      o_ref, *, eps):
    # Linear: y = x @ W^T + b.  W is in PyTorch layout (out_features, in_features);
    # contract x dim 1 with W dim 1 so no transpose is ever materialized.
    y = lax.dot_general(x_ref[...], w_ref[...],
                        dimension_numbers=(((1,), (1,)), ((), ())),
                        preferred_element_type=jnp.float32)
    y = y + b_ref[...]                                        # (tm, N), f32

    # Per-window LayerNorm via MXU-routed reductions/broadcasts:
    #   red : (N, win)  block indicator / d_model  -> per-window means
    #   bc  : (win, N)  block indicator            -> broadcast back to N lanes
    red = red_ref[...]
    bc = bc_ref[...]

    mean_w = jnp.dot(y, red, preferred_element_type=jnp.float32)       # (tm, win)
    mu = jnp.dot(mean_w, bc, preferred_element_type=jnp.float32)       # (tm, N)
    d = y - mu
    var_w = jnp.dot(d * d, red, preferred_element_type=jnp.float32)    # (tm, win)
    rstd_w = lax.rsqrt(var_w + eps)                                     # (tm, win)
    rstd = jnp.dot(rstd_w, bc, preferred_element_type=jnp.float32)     # (tm, N)

    # Single lane-dense full-width store.
    o_ref[...] = (d * rstd * g_ref[...] + be_ref[...]).astype(o_ref.dtype)


def _round_up(x, m):
    return (x + m - 1) // m * m


def _pick_tm(M, d_model, win_size, *, tm_max=512, budget=40 * 1024 * 1024):
    """Largest row tile (multiple of 8) whose per-grid-step VMEM footprint fits."""
    N = d_model * win_size
    bpe = 4
    fixed = 2 * N * d_model * bpe                 # weight (double-buffered alloc)
    fixed += 2 * 3 * N * bpe                      # bias / gamma / beta
    fixed += 2 * 2 * N * win_size * bpe           # indicator matrices
    tm = tm_max
    while tm > 8:
        per_step = (2 * tm * d_model              # x tile (double-buffered)
                    + 2 * tm * N                  # out tile (double-buffered)
                    + 3 * tm * N)                 # y / d / rstd intermediates
        if fixed + per_step * bpe <= budget:
            break
        tm //= 2
    tm = min(tm, _round_up(M, 8))
    return max(8, (tm // 8) * 8)


def seg_split_new(x, weight, bias, gamma, beta, *, win_size, eps=1e-5,
                  tm_max=512, matmul_dtype=None,
                  vmem_limit_bytes=48 * 1024 * 1024):
    """
    x:      (B, ts_d, L, d_model)
    weight: (d_model * win_size, d_model)   -- PyTorch nn.Linear weight layout
    bias:   (d_model * win_size,)
    gamma:  (d_model,)   LayerNorm weight
    beta:   (d_model,)   LayerNorm bias
    returns (B, ts_d, L * win_size, d_model)
    """
    B, ts_d, L, d_model = x.shape
    N = d_model * win_size
    assert weight.shape == (N, d_model), weight.shape
    M = B * ts_d * L

    tm = _pick_tm(M, d_model, win_size, tm_max=tm_max)
    grid = (pl.cdiv(M, tm),)

    x2 = x.reshape(M, d_model)
    w2 = weight
    if matmul_dtype is not None:                 # e.g. jnp.bfloat16 on v6e/v7x
        x2 = x2.astype(matmul_dtype)
        w2 = w2.astype(matmul_dtype)

    b2 = bias.reshape(1, N).astype(jnp.float32)
    g2 = jnp.tile(gamma.astype(jnp.float32), win_size).reshape(1, N)
    be2 = jnp.tile(beta.astype(jnp.float32), win_size).reshape(1, N)

    # Block-indicator matrices: column j belongs to window j // d_model.
    win_id = jnp.arange(N, dtype=jnp.int32) // d_model
    onehot = (win_id[:, None] == jnp.arange(win_size, dtype=jnp.int32)[None, :])
    red = onehot.astype(jnp.float32) / jnp.float32(d_model)      # (N, win)
    bc = onehot.T.astype(jnp.float32)                            # (win, N)

    kernel = functools.partial(_seg_split_kernel, eps=eps)

    out = pl.pallas_call(
        kernel,
        out_shape=jax.ShapeDtypeStruct((M, N), x.dtype),
        grid_spec=pltpu.PrefetchScalarGridSpec(
            num_scalar_prefetch=0,
            grid=grid,
            in_specs=[
                pl.BlockSpec((tm, d_model), lambda i: (i, 0)),      # x row tile
                pl.BlockSpec((N, d_model), lambda i: (0, 0)),       # weight (resident)
                pl.BlockSpec((1, N), lambda i: (0, 0)),             # bias
                pl.BlockSpec((1, N), lambda i: (0, 0)),             # gamma (tiled to N)
                pl.BlockSpec((1, N), lambda i: (0, 0)),             # beta  (tiled to N)
                pl.BlockSpec((N, win_size), lambda i: (0, 0)),      # reduce matrix
                pl.BlockSpec((win_size, N), lambda i: (0, 0)),      # broadcast matrix
            ],
            out_specs=pl.BlockSpec((tm, N), lambda i: (i, 0)),      # lane-dense 2-D
        ),
        compiler_params=pltpu.CompilerParams(
            dimension_semantics=("parallel",),
            vmem_limit_bytes=vmem_limit_bytes),
    )(x2, w2, b2, g2, be2, red, bc)

    # (M, win_size*d_model) is row-major identical to
    # (B, ts_d, L, win_size, d_model) -> free reshape to the module's output layout.
    return out.reshape(B, ts_d, L * win_size, d_model)


def seg_split_ref(x, weight, bias, gamma, beta, *, win_size, eps=1e-5):
    """Pure-JAX reference (matches the PyTorch module)."""
    B, ts_d, L, d_model = x.shape
    y = jnp.einsum("btld,od->btlo", x, weight) + bias            # Linear
    y = y.reshape(B, ts_d, L * win_size, d_model)                 # rearrange
    mu = jnp.mean(y, axis=-1, keepdims=True)
    var = jnp.mean((y - mu) ** 2, axis=-1, keepdims=True)
    return (y - mu) * lax.rsqrt(var + eps) * gamma + beta         # LayerNorm


if __name__ == "__main__":
    # Small shapes consistent with the module's forward.
    # L=10 makes M=80 so the tm_max=32 run exercises the masked-tail block.
    B, ts_d, L, d_model, win_size = 2, 4, 10, 32, 2

    key = jax.random.PRNGKey(0)
    kx, kw, kb, kg, kbe = jax.random.split(key, 5)

    x = jax.random.normal(kx, (B, ts_d, L, d_model), dtype=jnp.float32)
    weight = jax.random.normal(kw, (d_model * win_size, d_model),
                               dtype=jnp.float32) * (1.0 / jnp.sqrt(d_model))
    bias = jax.random.normal(kb, (d_model * win_size,), dtype=jnp.float32) * 0.01
    gamma = 1.0 + 0.1 * jax.random.normal(kg, (d_model,), dtype=jnp.float32)
    beta = 0.1 * jax.random.normal(kbe, (d_model,), dtype=jnp.float32)

    ref = seg_split_ref(x, weight, bias, gamma, beta, win_size=win_size)

    # Multi-step grid with a masked tail block (M=80, tm=32 -> grid=3).
    out = seg_split_new(x, weight, bias, gamma, beta,
                        win_size=win_size, tm_max=32)
    out = jax.block_until_ready(out)
    assert out.shape == (B, ts_d, L * win_size, d_model), out.shape
    assert jnp.allclose(out, ref, atol=1e-5, rtol=1e-5), \
        float(jnp.max(jnp.abs(out - ref)))

    # Default (large, VMEM-budgeted) tile path: single block covering all rows.
    out2 = jax.block_until_ready(
        seg_split_new(x, weight, bias, gamma, beta, win_size=win_size))
    assert jnp.allclose(out2, ref, atol=1e-5, rtol=1e-5), \
        float(jnp.max(jnp.abs(out2 - ref)))

    print("KERNEL_OK")
</pallas_src>

<mosaic_0001>
module attributes {stable_mosaic.version = 11 : i64} {
  func.func @_seg_split_kernel(%arg0: i32, %arg1: memref<32x32xf32, #tpu.memory_space<vmem>>, %arg2: memref<64x32xf32, #tpu.memory_space<vmem>>, %arg3: memref<1x64xf32, #tpu.memory_space<vmem>>, %arg4: memref<1x64xf32, #tpu.memory_space<vmem>>, %arg5: memref<1x64xf32, #tpu.memory_space<vmem>>, %arg6: memref<64x2xf32, #tpu.memory_space<vmem>>, %arg7: memref<2x64xf32, #tpu.memory_space<vmem>>, %arg8: memref<32x64xf32, #tpu.memory_space<vmem>>) attributes {dimension_semantics = [#tpu.dimension_semantics<parallel>], iteration_bounds = array<i64: 3>, scalar_prefetch = 0 : i64, scratch_operands = 0 : i64, tpu.core_type = #tpu.core_type<tc>, window_params = [{transform_indices = @transform_0, window_bounds = array<i64: 32, 32>}, {pipeline_mode = #tpu.pipeline_mode<synchronous>, transform_indices = @transform_1, window_bounds = array<i64: 64, 32>}, {pipeline_mode = #tpu.pipeline_mode<synchronous>, transform_indices = @transform_2, window_bounds = array<i64: 1, 64>}, {pipeline_mode = #tpu.pipeline_mode<synchronous>, transform_indices = @transform_3, window_bounds = array<i64: 1, 64>}, {pipeline_mode = #tpu.pipeline_mode<synchronous>, transform_indices = @transform_4, window_bounds = array<i64: 1, 64>}, {pipeline_mode = #tpu.pipeline_mode<synchronous>, transform_indices = @transform_5, window_bounds = array<i64: 64, 2>}, {pipeline_mode = #tpu.pipeline_mode<synchronous>, transform_indices = @transform_6, window_bounds = array<i64: 2, 64>}, {transform_indices = @transform_7, window_bounds = array<i64: 32, 64>}]} {
    %c0 = arith.constant 0 : index
    %c0_0 = arith.constant 0 : index
    %0 = vector.load %arg1[%c0, %c0_0] : memref<32x32xf32, #tpu.memory_space<vmem>>, vector<32x32xf32>
    %c0_1 = arith.constant 0 : index
    %c0_2 = arith.constant 0 : index
    %1 = vector.load %arg2[%c0_1, %c0_2] : memref<64x32xf32, #tpu.memory_space<vmem>>, vector<64x32xf32>
    %cst = arith.constant dense<0.000000e+00> : vector<32x64xf32>
    %2 = tpu.matmul %0, %1, %cst {dimension_numbers = #tpu.dot_dimension_numbers<[1], [1], [0], [0], [0, 0, 1, 0], [], []>} : vector<32x32xf32>, vector<64x32xf32>, vector<32x64xf32> -> vector<32x64xf32>
    %c0_3 = arith.constant 0 : index
    %c0_4 = arith.constant 0 : index
    %3 = vector.load %arg3[%c0_3, %c0_4] : memref<1x64xf32, #tpu.memory_space<vmem>>, vector<1x64xf32>
    %4 = vector.broadcast %3 : vector<1x64xf32> to vector<32x64xf32>
    %5 = arith.addf %2, %4 : vector<32x64xf32>
    %c0_5 = arith.constant 0 : index
    %c0_6 = arith.constant 0 : index
    %6 = vector.load %arg6[%c0_5, %c0_6] : memref<64x2xf32, #tpu.memory_space<vmem>>, vector<64x2xf32>
    %c0_7 = arith.constant 0 : index
    %c0_8 = arith.constant 0 : index
    %7 = vector.load %arg7[%c0_7, %c0_8] : memref<2x64xf32, #tpu.memory_space<vmem>>, vector<2x64xf32>
    %cst_9 = arith.constant dense<0.000000e+00> : vector<32x2xf32>
    %8 = tpu.matmul %5, %6, %cst_9 {dimension_numbers = #tpu.dot_dimension_numbers<[1], [0], [0], [1], [0, 0, 1, 1], [], []>} : vector<32x64xf32>, vector<64x2xf32>, vector<32x2xf32> -> vector<32x2xf32>
    %cst_10 = arith.constant dense<0.000000e+00> : vector<32x64xf32>
    %9 = tpu.matmul %8, %7, %cst_10 {dimension_numbers = #tpu.dot_dimension_numbers<[1], [0], [0], [1], [0, 0, 1, 1], [], []>} : vector<32x2xf32>, vector<2x64xf32>, vector<32x64xf32> -> vector<32x64xf32>
    %10 = arith.subf %5, %9 : vector<32x64xf32>
    %11 = arith.mulf %10, %10 : vector<32x64xf32>
    %cst_11 = arith.constant dense<0.000000e+00> : vector<32x2xf32>
    %12 = tpu.matmul %11, %6, %cst_11 {dimension_numbers = #tpu.dot_dimension_numbers<[1], [0], [0], [1], [0, 0, 1, 1], [], []>} : vector<32x64xf32>, vector<64x2xf32>, vector<32x2xf32> -> vector<32x2xf32>
    %cst_12 = arith.constant 9.99999974E-6 : f32
    %13 = vector.broadcast %cst_12 : f32 to vector<32x2xf32>
    %14 = arith.addf %12, %13 : vector<32x2xf32>
    %15 = math.rsqrt %14 : vector<32x2xf32>
    %cst_13 = arith.constant dense<0.000000e+00> : vector<32x64xf32>
    %16 = tpu.matmul %15, %7, %cst_13 {dimension_numbers = #tpu.dot_dimension_numbers<[1], [0], [0], [1], [0, 0, 1, 1], [], []>} : vector<32x2xf32>, vector<2x64xf32>, vector<32x64xf32> -> vector<32x64xf32>
    %17 = arith.mulf %10, %16 : vector<32x64xf32>
    %c0_14 = arith.constant 0 : index
    %c0_15 = arith.constant 0 : index
    %18 = vector.load %arg4[%c0_14, %c0_15] : memref<1x64xf32, #tpu.memory_space<vmem>>, vector<1x64xf32>
    %19 = vector.broadcast %18 : vector<1x64xf32> to vector<32x64xf32>
    %20 = arith.mulf %17, %19 : vector<32x64xf32>
    %c0_16 = arith.constant 0 : index
    %c0_17 = arith.constant 0 : index
    %21 = vector.load %arg5[%c0_16, %c0_17] : memref<1x64xf32, #tpu.memory_space<vmem>>, vector<1x64xf32>
    %22 = vector.broadcast %21 : vector<1x64xf32> to vector<32x64xf32>
    %23 = arith.addf %20, %22 : vector<32x64xf32>
    %c0_18 = arith.constant 0 : index
    %c0_19 = arith.constant 0 : index
    %24 = vector.load %arg8[%c0_18, %c0_19] : memref<32x64xf32, #tpu.memory_space<vmem>>, vector<32x64xf32>
    tpu.vector_store %arg8[%c0_18, %c0_19], %23 {strides = array<i32>} : memref<32x64xf32, #tpu.memory_space<vmem>>, vector<32x64xf32>,
    return
  }
  func.func @transform_0(%arg0: i32) -> (i32, i32) {
    %c0_i32 = arith.constant 0 : i32
    %c0_i32_0 = arith.constant 0 : i32
    return %arg0, %c0_i32 : i32, i32
  }
  func.func @transform_1(%arg0: i32) -> (i32, i32) {
    %c0_i32 = arith.constant 0 : i32
    %c0_i32_0 = arith.constant 0 : i32
    %c0_i32_1 = arith.constant 0 : i32
    return %c0_i32, %c0_i32_0 : i32, i32
  }
  func.func @transform_2(%arg0: i32) -> (i32, i32) {
    %c0_i32 = arith.constant 0 : i32
    %c0_i32_0 = arith.constant 0 : i32
    %c0_i32_1 = arith.constant 0 : i32
    return %c0_i32, %c0_i32_0 : i32, i32
  }
  func.func @transform_3(%arg0: i32) -> (i32, i32) {
    %c0_i32 = arith.constant 0 : i32
    %c0_i32_0 = arith.constant 0 : i32
    %c0_i32_1 = arith.constant 0 : i32
    return %c0_i32, %c0_i32_0 : i32, i32
  }
  func.func @transform_4(%arg0: i32) -> (i32, i32) {
    %c0_i32 = arith.constant 0 : i32
    %c0_i32_0 = arith.constant 0 : i32
    %c0_i32_1 = arith.constant 0 : i32
    return %c0_i32, %c0_i32_0 : i32, i32
  }
  func.func @transform_5(%arg0: i32) -> (i32, i32) {
    %c0_i32 = arith.constant 0 : i32
    %c0_i32_0 = arith.constant 0 : i32
    %c0_i32_1 = arith.constant 0 : i32
    return %c0_i32, %c0_i32_0 : i32, i32
  }
  func.func @transform_6(%arg0: i32) -> (i32, i32) {
    %c0_i32 = arith.constant 0 : i32
    %c0_i32_0 = arith.constant 0 : i32
    %c0_i32_1 = arith.constant 0 : i32
    return %c0_i32, %c0_i32_0 : i32, i32
  }
  func.func @transform_7(%arg0: i32) -> (i32, i32) {
    %c0_i32 = arith.constant 0 : i32
    %c0_i32_0 = arith.constant 0 : i32
    return %arg0, %c0_i32 : i32, i32
  }
}

</mosaic_0001>

<bundles_post_ra>
// kernel: tpu_custom_call.1
= control target key start
LH: loop header
LB: loop body
LE: loop exit
PB: predicated region body
PF: predicated region fallthrough
CT: control target
= control target key end

     0   :  { %s1146_s24 = smov 0   ;;  %s1148_s25 = smov 0   ;;  %s1358_s0 = inlined_call_operand.vmem [shape: f32[80,32], index: 0, kind: input, shape index: {}]   ;;  %s1359_s1 = inlined_call_operand.vmem [shape: f32[64,32], index: 1, kind: input, shape index: {}]   ;;  %s1360_s2 = inlined_call_operand.vmem [shape: f32[1,64], index: 2, kind: input, shape index: {}]   ;;  %s1361_s3 = inlined_call_operand.vmem [shape: f32[1,64], index: 3, kind: input, shape index: {}]   ;;  %s1362_s4 = inlined_call_operand.vmem [shape: f32[1,64], index: 4, kind: input, shape index: {}]   ;;  %s1363_s5 = inlined_call_operand.vmem [shape: f32[64,2], index: 5, kind: input, shape index: {}]   ;;  %s1364_s6 = inlined_call_operand.vmem [shape: f32[2,64], index: 6, kind: input, shape index: {}]   ;;  %s1365_s7 = inlined_call_operand.vmem [shape: f32[80,64], index: 7, kind: output, shape index: {}]  }
   0x1   :  { %s1150_s26 = smov 0  }
   0x2 LB: > { %s1159_s27 = sadd.s32 4294967295, %s1072_s26   ;;  %s1161_s28 = sadd.s32 1, %s1072_s26   ;;  %s1072_s26 = sphi %s1150_s26, %s1372_s26   ;;  %s1068_s25 = sphi %s1148_s25, %s1371_s25   ;;  %s1064_s24 = sphi %s1146_s24, %s1370_s24  }
   0x3   : > { %s173_s29 = ssub.s32 %s1072_s26, %s1161_s28  ;;  %s176_s30 = sadd.s32 1, %s1068_s25 }
   0x4   : > { %p174_p0 = scmp.eq.s32.totalorder %s173_s29, 0  ;;  %p186_p1 = scmp.ne.s32.totalorder %s1068_s25, %s1064_s24 }
   0x5   : > { %p187_p2 = scmp.eq.s32.totalorder %s1159_s27, 2  ;;  %p864_p3 = scmp.ge.s32.totalorder %s1072_s26, 1 }
   0x6   : > { %s1169_s8 = scalar_select %p174_p0, %s1068_s25, %s176_s30  }
   0x7   : > { %p1171_p4 = por %p187_p2, %p186_p1  ;;  %p246_p5 = scmp.lt.s32.totalorder %s1072_s26, 4 }
   0x9   : > { %p247_p6 = pnand %p864_p3, %p246_p5 }
   0xa   : > { %s1191_s18 = sshll.u32 (!%p247_p6), %s1159_s27, 2  ;;  %s278_s20 = sand.u32 (!%p247_p6), 1, %s1064_s24  }
   0xb   : > { %250 = sbr.rel (%p247_p6) target bundleno = 792 (0x318), region = 48  ;;  %p286_p7 = scmp.lt.s32.totalorder (!%p247_p6), %s1191_s18, 9 }
  0x10   : > { %v311_v0 = vld [vmem:[%s1359_s1 + $0x38] sm:$0xff]  ;;  %vm316_vm0 = vcmask 261120   ;;  %v310_v1 = vld [vmem:[%s1359_s1 + $0x30] sm:$0xff]  ;;  %v309_v2 = vld [vmem:[%s1359_s1 + $0x28] sm:$0xff]  ;;  %s287_s23 = scalar_select %p286_p7, %s1191_s18, 9  ;;  %vm446_vm1 = vcmask 1041408  }
  0x11   : > { %868 = vmatpush.xpose.msk.msra.mxu0 %vm316_vm0, %v311_v0  ;;  %v308_v3 = vld [vmem:[%s1359_s1 + $0x20] sm:$0xff]  ;;  %v307_v4 = vld [vmem:[%s1359_s1 + $0x18] sm:$0xff]  ;;  %v306_v5 = vld [vmem:[%s1359_s1 + $0x10] sm:$0xff]  ;;  %vm391_vm2 = vcmask 523264   ;;  %vm433_vm3 = vcmask 15360   ;;  %s641_s24 = ssub.s32 (%p1171_p4), 10, %s1191_s18 }
  0x12   : > { %v305_v6 = vld [vmem:[%s1359_s1 + $0x8] sm:$0xff]  ;;  %s867_s30 = sshll.u32 %s287_s23, 3  ;;  %v389_v7 = vld [vmem:[%s1363_s5 + $0x38] sm:$0xff]  ;;  %v388_v8 = vld [vmem:[%s1363_s5 + $0x30] sm:$0xff]  ;;  %s865_s23 = sshll.u32 %s278_s20, 5 }
  0x13   : > { %412 = vmatpush.msra.mxu1 %v389_v7  ;;  %v304_v9 = vld [vmem:[%s1359_s1] sm:$0xff]  ;;  %s289_s19 = scalar_lea.vmem %s1358_s0, %s867_s30  ;;  %v387_v10 = vld [vmem:[%s1363_s5 + $0x28] sm:$0xff]  ;;  %507 = vmatpush.msra.mxu3 %v389_v7  ;;  %v385_v13 = vld [vmem:[%s1363_s5 + $0x18] sm:$0xff]  ;;  %s1289_s30 = scalar_lea.vmem [#allocation2], %s865_s23  }
  0x14   : > { %v386_v11 = vld [vmem:[%s1363_s5 + $0x20] sm:$0xff]  ;;  %v384_v14 = vld [vmem:[%s1363_s5 + $0x10] sm:$0xff]  ;;  %v301_v15 = vld [vmem:[%s289_s19 + $0x8] sm:$0xff]  ;;  %s915_s10 = sshll.u32 (%p1171_p4), %s1159_s27, 5  ;;  %p642_p8 = scmp.lt.s32.totalorder (%p1171_p4), %s641_s24, 4 }
  0x15   : > { %869 = vmatpush.xpose.msk.msra.mxu0 %vm316_vm0, %v310_v1  ;;  %413 = vmatpush.msra.mxu1 %v388_v8  ;;  %v300_v12 = vld [vmem:[%s289_s19] sm:$0xff]  ;;  %v302_v16 = vld [vmem:[%s289_s19 + $0x10] sm:$0xff]  ;;  %v303_v17 = vld [vmem:[%s289_s19 + $0x18] sm:$0xff]  ;;  %s1309_s13 = scalar_lea.vmem (%p1171_p4), %s1365_s7, %s915_s10  }
  0x16   : > { %508 = vmatpush.msra.mxu3 %v388_v8  ;;  %v383_v18 = vld [vmem:[%s1363_s5 + $0x8] sm:$0xff]  ;;  %v382_v19 = vld [vmem:[%s1363_s5] sm:$0xff] }
  0x17   : > { %414 = vmatpush.msra.mxu1 %v387_v10  ;;  %v390_v20 = vld [vmem:[%s1364_s6] sm:$0x3] }
  0x18   : > { %509 = vmatpush.msra.mxu3 %v387_v10  ;;  %918 = vmatpush.msk.msra.mxu2 %vm446_vm1, %v390_v20  ;;  %v1007_v21 = vld [vmem:[%s1360_s2] ss:$0 sm:$0xff] }
  0x19   : > { %870 = vmatpush.xpose.msk.msra.mxu0 %vm316_vm0, %v309_v2  ;;  %415 = vmatpush.msra.mxu1 %v386_v11 }
  0x1a   : > { %510 = vmatpush.msra.mxu3 %v386_v11  ;;  %893 = vmatpush.msk.msrb.mxu2 %vm446_vm1, %v390_v20 }
  0x1b   : > { %416 = vmatpush.msra.mxu1 %v385_v13 }
  0x1c   : > { %511 = vmatpush.msra.mxu3 %v385_v13 }
  0x1d   : > { %871 = vmatpush.xpose.msk.msra.mxu0 %vm316_vm0, %v308_v3  ;;  %417 = vmatpush.msra.mxu1 %v384_v14 }
  0x1e   : > { %512 = vmatpush.msra.mxu3 %v384_v14 }
  0x1f   : > { %418 = vmatpush.msra.mxu1 %v383_v18 }
  0x20   : > { %513 = vmatpush.msra.mxu3 %v383_v18  ;;  %v1008_v18 = vld [vmem:[%s1361_s3] ss:$0 sm:$0xff] }
  0x21   : > { %872 = vmatpush.xpose.msk.msra.mxu0 %vm316_vm0, %v307_v4  ;;  %419 = vmatpush.msra.mxu1 %v382_v19 }
  0x22   : > { %514 = vmatpush.msra.mxu3 %v382_v19 }
  0x23   : > { %884 = vmatpush.msk.msrb.mxu1 %vm446_vm1, %v390_v20 }
  0x25   : > { %873 = vmatpush.xpose.msk.msra.mxu0 %vm316_vm0, %v306_v5 }
  0x29   : > { %874 = vmatpush.xpose.msk.msra.mxu0 %vm316_vm0, %v305_v6 }
  0x2d   : > { %875 = vmatpush.xpose.msk.msra.mxu0 %vm316_vm0, %v304_v9 }
  0x30   : > { %876 = vmatmul.msk.f32.vlgmr.msra.gmra.mxu0 %vm316_vm0, %v300_v12 }
  0x38   : > { %877 = vmatmul.msk.f32.gmra.mxu0 %vm316_vm0, %v301_v15 }
  0x40   : > { %878 = vmatmul.msk.f32.gmra.mxu0 %vm316_vm0, %v302_v16 }
  0x48   : > { %879 = vmatmul.msk.f32.gmra.mxu0 %vm316_vm0, %v303_v17 }
  0xad   : > { %v370_v22 = vpop.f32.mrf.mxu0 }
  0xae   : > { %v371_v23 = vadd.f32 %v1007_v21, %v370_v22 }
  0xb0   : > { %880 = vmatmul.msk.f32.vlgmr.msra.gmra.mxu1 %vm391_vm2, %v371_v23 }
  0xb5   : > { %v373_v24 = vpop.f32.mrf.mxu0 }
  0xb6   : > { %v374_v25 = vadd.f32 %v1007_v21, %v373_v24 }
  0xb8   : > { %881 = vmatmul.msk.f32.gmra.mxu1 %vm391_vm2, %v374_v25 }
  0xbd   : > { %v376_v26 = vpop.f32.mrf.mxu0 }
  0xbe   : > { %v377_v27 = vadd.f32 %v1007_v21, %v376_v26 }
  0xc0   : > { %882 = vmatmul.msk.f32.gmra.mxu1 %vm391_vm2, %v377_v27 }
  0xc5   : > { %v379_v28 = vpop.f32.mrf.mxu0 }
  0xc6   : > { %v380_v29 = vadd.f32 %v1007_v21, %v379_v28  ;;  %v1009_v21 = vld [vmem:[%s1362_s4] ss:$0 sm:$0xff] }
  0xc8   : > { %883 = vmatmul.msk.f32.gmra.mxu1 %vm391_vm2, %v380_v29 }
 0x12d   : > { %v421_v30 = vpop.f32.mrf.mxu1 }
 0x12e   : > { %885 = vmatmul.msk.f32.vlgmr.msrb.gmra.mxu1 %vm433_vm3, %v421_v30 }
 0x135   : > { %v424_v31 = vpop.f32.mrf.mxu1 }
 0x136   : > { %886 = vmatmul.msk.f32.vlgmr.msra.gmra.mxu2 %vm433_vm3, %v424_v31 }
 0x13d   : > { %v427_v32 = vpop.f32.mrf.mxu1 }
 0x13e   : > { %887 = vmatmul.msk.f32.gmra.mxu2 %vm433_vm3, %v427_v32 }
 0x145   : > { %v430_v33 = vpop.f32.mrf.mxu1 }
 0x146   : > { %888 = vmatmul.msk.f32.gmra.mxu2 %vm433_vm3, %v430_v33 }
 0x1ab   : > { %v467_v34 = vpop.f32.mrf.mxu1 }
 0x1ac   : > { %v1257_v35 = vsub.f32 %v371_v23, %v467_v34 }
 0x1ae   : > { %v483_v36 = vmul.f32 %v1257_v35, %v1257_v35 }
 0x1b0   : > { %889 = vmatmul.msk.f32.vlgmr.msra.gmra.mxu3 %vm391_vm2, %v483_v36 }
 0x1b9   : > { %v470_v37 = vpop.f32.mrf.mxu2 }
 0x1ba   : > { %v1262_v38 = vsub.f32 %v374_v25, %v470_v37 }
 0x1bc   : > { %v484_v39 = vmul.f32 %v1262_v38, %v1262_v38 }
 0x1be   : > { %890 = vmatmul.msk.f32.gmra.mxu3 %vm391_vm2, %v484_v39 }
 0x1c1   : > { %v473_v40 = vpop.f32.mrf.mxu2 }
 0x1c2   : > { %v1267_v41 = vsub.f32 %v377_v27, %v473_v40 }
 0x1c4   : > { %v485_v42 = vmul.f32 %v1267_v41, %v1267_v41 }
 0x1c6   : > { %891 = vmatmul.msk.f32.gmra.mxu3 %vm391_vm2, %v485_v42 }
 0x1c9   : > { %v476_v43 = vpop.f32.mrf.mxu2 }
 0x1ca   : > { %v1272_v44 = vsub.f32 %v380_v29, %v476_v43 }
 0x1cc   : > { %v486_v45 = vmul.f32 %v1272_v44, %v1272_v44 }
 0x1ce   : > { %892 = vmatmul.msk.f32.gmra.mxu3 %vm391_vm2, %v486_v45 }
 0x233   : > { %v516_v46 = vpop.f32.mrf.mxu3 }
 0x234   : > { %v517_v47 = vadd.f32 1e-05, %v516_v46 }
 0x236   : > { %1010 = vrsqrt.f32 %v517_v47  ;;  %vm534_vm5 = vweird.f32 %v517_v47 }
 0x23c   : > { %v1011_v48 = vpop.eup %1010 }
 0x23d   : > { %v529_v49 = vmul.f32 %v1011_v48, %v517_v47  ;;  %vm535_vm4 = vweird.f32 %v1011_v48 }
 0x23e   : > { %vm536_vm6 = vmor %vm534_vm5, %vm535_vm4 }
 0x23f   : > { %v530_v50 = vmul.f32 %v1011_v48, %v529_v49 }
 0x241   : > { %v531_v51 = vmul.f32 0.5, %v530_v50  ;;  %v519_v52 = vpop.f32.mrf.mxu3 }
 0x242   : > { %v520_v53 = vadd.f32 1e-05, %v519_v52 }
 0x243   : > { %v532_v54 = vsub.f32 1.5, %v531_v51 }
 0x244   : > { %1012 = vrsqrt.f32 %v520_v53  ;;  %vm544_vm8 = vweird.f32 %v520_v53 }
 0x245   : > { %v533_v55 = vmul.f32 %v1011_v48, %v532_v54 }
 0x247   : > { %v537_v56 = vsel %vm536_vm6, %v1011_v48, %v533_v55 }
 0x248   : > { %894 = vmatmul.msk.f32.vlgmr.msrb.gmra.mxu2 %vm433_vm3, %v537_v56 }
 0x249   : > { %v522_v57 = vpop.f32.mrf.mxu3 }
 0x24a   : > { %v1013_v58 = vpop.eup %1012  ;;  %v523_v59 = vadd.f32 1e-05, %v522_v57 }
 0x24b   : > { %v539_v60 = vmul.f32 %v1013_v58, %v520_v53  ;;  %vm545_vm7 = vweird.f32 %v1013_v58 }
 0x24c   : > { %1014 = vrsqrt.f32 %v523_v59  ;;  %vm546_vm9 = vmor %vm544_vm8, %vm545_vm7  ;;  %vm554_vm11 = vweird.f32 %v523_v59 }
 0x24d   : > { %v540_v61 = vmul.f32 %v1013_v58, %v539_v60 }
 0x24f   : > { %v541_v62 = vmul.f32 0.5, %v540_v61 }
 0x251   : > { %v542_v63 = vsub.f32 1.5, %v541_v62  ;;  %v525_v0 = vpop.f32.mrf.mxu3 }
 0x252   : > { %v1015_v1 = vpop.eup %1014  ;;  %v526_v2 = vadd.f32 1e-05, %v525_v0 }
 0x253   : > { %v549_v3 = vmul.f32 %v1015_v1, %v523_v59  ;;  %v543_v4 = vmul.f32 %v1013_v58, %v542_v63  ;;  %vm555_vm10 = vweird.f32 %v1015_v1 }
 0x254   : > { %1016 = vrsqrt.f32 %v526_v2  ;;  %vm556_vm12 = vmor %vm554_vm11, %vm555_vm10  ;;  %vm564_vm14 = vweird.f32 %v526_v2 }
 0x255   : > { %v550_v5 = vmul.f32 %v1015_v1, %v549_v3  ;;  %v547_v6 = vsel %vm546_vm9, %v1013_v58, %v543_v4 }
 0x256   : > { %895 = vmatmul.msk.f32.gmra.mxu2 %vm433_vm3, %v547_v6 }
 0x257   : > { %v551_v7 = vmul.f32 0.5, %v550_v5 }
 0x259   : > { %v552_v8 = vsub.f32 1.5, %v551_v7 }
 0x25a   : > { %v1017_v9 = vpop.eup %1016 }
 0x25b   : > { %v559_v10 = vmul.f32 %v1017_v9, %v526_v2  ;;  %v553_v11 = vmul.f32 %v1015_v1, %v552_v8  ;;  %vm565_vm13 = vweird.f32 %v1017_v9 }
 0x25c   : > { %vm566_vm15 = vmor %vm564_vm14, %vm565_vm13 }
 0x25d   : > { %v560_v12 = vmul.f32 %v1017_v9, %v559_v10  ;;  %v557_v13 = vsel %vm556_vm12, %v1015_v1, %v553_v11 }
 0x25e   : > { %896 = vmatmul.msk.f32.gmra.mxu2 %vm433_vm3, %v557_v13 }
 0x25f   : > { %v561_v14 = vmul.f32 0.5, %v560_v12 }
 0x261   : > { %v562_v15 = vsub.f32 1.5, %v561_v14 }
 0x263   : > { %v563_v16 = vmul.f32 %v1017_v9, %v562_v15 }
 0x265   : > { %v567_v17 = vsel %vm566_vm15, %v1017_v9, %v563_v16 }
 0x266   : > { %897 = vmatmul.msk.f32.gmra.mxu2 %vm433_vm3, %v567_v17 }
 0x2cb   : > { %v597_v19 = vpop.f32.mrf.mxu2 }
 0x2cc   : > { %v609_v20 = vmul.f32 %v597_v19, %v1257_v35 }
 0x2ce   : > { %v617_v22 = vmul.f32 %v1008_v18, %v609_v20 }
 0x2d0   : > { %v625_v23 = vadd.f32 %v1009_v21, %v617_v22 }
 0x2d2   : > { %629 = vst.msk [vmem:[%s1289_s30] sm:$0xff] %vm391_vm2, %v625_v23 }
 0x2d9   : > { %v600_v24 = vpop.f32.mrf.mxu2 }
 0x2da   : > { %v610_v25 = vmul.f32 %v600_v24, %v1262_v38 }
 0x2dc   : > { %v618_v26 = vmul.f32 %v1008_v18, %v610_v25 }
 0x2de   : > { %v626_v27 = vadd.f32 %v1009_v21, %v618_v26 }
 0x2e0   : > { %630 = vst.msk [vmem:[%s1289_s30 + $0x8] sm:$0xff] %vm391_vm2, %v626_v27 }
 0x2e1   : > { %v603_v28 = vpop.f32.mrf.mxu2 }
 0x2e2   : > { %v611_v29 = vmul.f32 %v603_v28, %v1267_v41 }
 0x2e4   : > { %v619_v30 = vmul.f32 %v1008_v18, %v611_v29 }
 0x2e6   : > { %v627_v31 = vadd.f32 %v1009_v21, %v619_v30 }
 0x2e8   : > { %631 = vst.msk [vmem:[%s1289_s30 + $0x10] sm:$0xff] %vm391_vm2, %v627_v31 }
 0x2e9   : > { %v606_v32 = vpop.f32.mrf.mxu2 }
 0x2ea   : > { %v612_v33 = vmul.f32 %v606_v32, %v1272_v44 }
 0x2ec   : > { %v620_v34 = vmul.f32 %v1008_v18, %v612_v33  ;;  %639 = sbr.rel (!%p1171_p4) target bundleno = 792 (0x318), region = 52 }
 0x2ee   : > { %v628_v35 = vadd.f32 %v1009_v21, %v620_v34 }
 0x2f0   : > { %632 = vst.msk [vmem:[%s1289_s30 + $0x18] sm:$0xff] %vm391_vm2, %v628_v35 }
 0x2f1   : > { %s1374_s24 = smov (!%p642_p8, %s641_s24), 4 }
 0x2f2   : > { %s900_s14 = sshll.u32 %s1374_s24, 3 }
 0x2f3   : > { %p903_p9 = scmp.eq.s32.totalorder %s900_s14, 0 }
 0x2f4   : > { %s1315_s15 = sshrl.u32 (!%p903_p9), %s1374_s24, 2 }
 0x2f5   : > { %650 = sbr.rel (%p903_p9) target bundleno = 792 (0x318), region = 56  ;;  %p904_p10 = scmp.le.s32.totalorder (!%p903_p9), %s1315_s15, 0 }
 0x2fa   : > { %817 = sbr.rel (%p904_p10) target bundleno = 775 (0x307), region = 132  ;;  %s1367_s27 = smov (!%p904_p10), %s1309_s13 }
 0x2fb   : > { %s1368_s9 = smov (!%p904_p10), %s1289_s30  ;;  %s1324_s18 = smov (!%p904_p10), 0  }
 0x2fc   : > { %s1086_s16 = smov (!%p904_p10), 0  }
 0x2ff LB: >> { %v719_v36 = vld [vmem:[%s1080_s9] sm:$0xff]  ;;  %v721_v37 = vld [vmem:[%s1080_s9 + $0x8] sm:$0xff]  ;;  %v723_v38 = vld [vmem:[%s1080_s9 + $0x10] sm:$0xff]  ;;  %s727_s17 = sadd.s32 1, %s1084_s18  ;;  %s713_s16 = sadd.s32 1, %s1088_s16   ;;  %s1088_s16 = sphi %s1086_s16, %s713_s16   ;;  %s1084_s18 = sphi %s1324_s18, %s1369_s18   ;;  %s1080_s9 = sphi %s1368_s9, %s732_s9   ;;  %s1076_s27 = sphi %s1367_s27, %s733_s27  }
 0x300   : >> { %720 = vst [vmem:[%s1076_s27] sm:$0xff] %v719_v36  ;;  %v725_v39 = vld [vmem:[%s1080_s9 + $0x18] sm:$0xff]  ;;  %p728_p11 = scmp.ge.s32.totalorder %s727_s17, %s1315_s15  ;;  %p712_p12 = scmp.ge.s32.totalorder %s713_s16, %s1315_s15 }
 0x301   : >> { %722 = vst [vmem:[%s1076_s27 + $0x8] sm:$0xff] %v721_v37 }
 0x302   : >> { %724 = vst [vmem:[%s1076_s27 + $0x10] sm:$0xff] %v723_v38  ;;  %s1376_s17 = smov (%p728_p11, %s727_s17), 0  ;;  %715 = sbr.rel (!%p712_p12) target bundleno = 767 (0x2ff), region = 138 }
 0x303   : >> { %726 = vst [vmem:[%s1076_s27 + $0x18] sm:$0xff] %v725_v39  ;;  %s905_s19 = sshll.u32 %s1376_s17, 5  ;;  %s1369_s18 = smov %s1376_s17 }
 0x304   : >> { %s732_s9 = scalar_lea.vmem %s1289_s30, %s905_s19 [#allocation2]   ;;  %s733_s27 = scalar_lea.vmem %s1309_s13, %s905_s19  }
 0x307 PF: > { %s1340_s20 = sand.u32 3, %s1374_s24   ;;  %s916_s21 = sshll.u32 %s1315_s15, 5 }
 0x308   : > { %s738_s22 = scalar_lea.vmem %s1289_s30, %s916_s21 [#allocation2]   ;;  %s740_s23 = scalar_lea.vmem %s1309_s13, %s916_s21  }
 0x309   : > { %p910_p13 = scmp.le.s32.totalorder %s1340_s20, 0 }
 0x30a   : > { %s1090_s26 = smov (!%p910_p13), %s740_s23   ;;  %s1094_s29 = smov (!%p910_p13), %s738_s22  }
 0x30b   : > { %831 = sbr.rel (%p910_p13) target bundleno = 792 (0x318), region = 143  ;;  %s1098_s10 = smov (!%p910_p13), 0  }
 0x30c   : > { %s1102_s11 = smov (!%p910_p13), 0  }
 0x310 LB: >> { %v750_v40 = vld [vmem:[%s1096_s29] sm:$0xff]  ;;  %s752_s24 = sadd.s32 1, %s1100_s10  ;;  %s744_s11 = sadd.s32 1, %s1104_s11   ;;  %s1104_s11 = sphi %s1102_s11, %s744_s11   ;;  %s1100_s10 = sphi %s1098_s10, %s1099_s10   ;;  %s1096_s29 = sphi %s1094_s29, %s757_s29   ;;  %s1092_s26 = sphi %s1090_s26, %s758_s26  }
 0x311   : >> { %751 = vst [vmem:[%s1092_s26] sm:$0xff] %v750_v40  ;;  %p753_p0 = scmp.ge.s32.totalorder %s752_s24, %s1340_s20  ;;  %p743_p1 = scmp.ge.s32.totalorder %s744_s11, %s1340_s20 }
 0x313   : >> { %s1378_s24 = smov (%p753_p0, %s752_s24), 0  ;;  %746 = sbr.rel (!%p743_p1) target bundleno = 784 (0x310), region = 149 }
 0x314   : >> { %s911_s30 = sshll.u32 %s1378_s24, 3  ;;  %s1099_s10 = smov %s1378_s24  }
 0x315   : >> { %s757_s29 = scalar_lea.vmem %s738_s22, %s911_s30 [#allocation2]   ;;  %s758_s26 = scalar_lea.vmem %s740_s23, %s911_s30  }
 0x318 PF: > { %p14_p2 = scmp.ge.s32.totalorder %s1161_s28, 5   ;;  %s1370_s24 = smov %s1068_s25 }
 0x319   : > { %s1371_s25 = smov %s1169_s8  ;;  %s1372_s26 = smov %s1161_s28 }
 0x31a   :  { %16 = sbr.rel (!%p14_p2) target bundleno = 2 (0x2), region = 160 }

</bundles_post_ra>
